<compile_context>
chip_gen: v6e
topology: v6e:2x2x1
jax: 0.10.0
libtpu: 0.0.40
codegen_flags: <defaults>
</compile_context>

<pallas_src>
import functools

import jax
import jax.numpy as jnp
from jax.experimental import pallas as pl
from jax.experimental.pallas import tpu as pltpu


# --------------------------------------------------------------------------
# Generation detection (safe fallbacks if the query fails).
# --------------------------------------------------------------------------
def _device_kind() -> str:
    try:
        return jax.devices()[0].device_kind.lower()
    except Exception:
        return ""


def _num_inflight_dmas() -> int:
    # v7x needs more concurrent descriptors to feed ~3.2 TB/s HBM; 4 is
    # already enough for v5e/v6e.
    return 8 if "v7" in _device_kind() else 4


# --------------------------------------------------------------------------
# Direct HBM->HBM DMA path (large seq_len): zero VMEM, zero compute.
# --------------------------------------------------------------------------
def _make_row_chunks(total_rows: int, n_sub: int):
    """Ceil-div split of [0, total_rows) into <= n_sub (start, size) chunks."""
    n_sub = max(1, min(n_sub, total_rows))
    chunk = -(-total_rows // n_sub)  # ceil
    chunks = []
    r = 0
    while r < total_rows:
        nr = min(chunk, total_rows - r)
        chunks.append((r, nr))
        r += nr
    return tuple(chunks)


def _cut_sequence_dma_kernel(x_hbm, o_hbm, sem, *, offset, seq_len, chunks):
    # x_hbm: (R, L) HBM ref; o_hbm: (R, seq_len) HBM ref; sem: (n_chunks,) DMA sems.
    # Single grid step: start every chunk's DMA (all concurrently in flight),
    # then wait once.  Starts/sizes are Python-static, so no tail clamping or
    # divisor constraints are needed.
    copies = []
    for j, (r0, nr) in enumerate(chunks):  # static Python loop -> unrolled
        cp = pltpu.make_async_copy(
            x_hbm.at[pl.ds(r0, nr), pl.ds(offset, seq_len)],  # strided HBM read
            o_hbm.at[pl.ds(r0, nr)],                          # contiguous HBM write
            sem.at[j],
        )
        cp.start()
        copies.append(cp)
    for cp in copies:
        cp.wait()


def _cut_sequence_dma(x2d: jax.Array, seq_len: int, offset: int) -> jax.Array:
    total_rows, l = x2d.shape
    chunks = _make_row_chunks(total_rows, _num_inflight_dmas())

    kernel = functools.partial(
        _cut_sequence_dma_kernel, offset=offset, seq_len=seq_len, chunks=chunks)

    return pl.pallas_call(
        kernel,
        out_shape=jax.ShapeDtypeStruct((total_rows, seq_len), x2d.dtype),
        grid=(1,),
        in_specs=[pl.BlockSpec(memory_space=pl.ANY)],   # raw HBM ref, no auto-DMA
        out_specs=pl.BlockSpec(memory_space=pl.ANY),    # written via direct DMA
        scratch_shapes=[pltpu.SemaphoreType.DMA((len(chunks),))],
        compiler_params=pltpu.CompilerParams(
            has_side_effects=True,   # output written only via manual DMA
        ),
    )(x2d)


# --------------------------------------------------------------------------
# VMEM-staged path (tiny seq_len): contiguous full-row reads, slice in VMEM,
# lane-dense contiguous output writes.  Auto-pipelined by BlockSpec.
# --------------------------------------------------------------------------
def _cut_sequence_vmem_kernel(x_ref, o_ref, *, offset, seq_len):
    o_ref[...] = x_ref[:, offset:offset + seq_len]


def _cut_sequence_vmem(x2d: jax.Array, seq_len: int, offset: int):
    total_rows, l = x2d.shape
    itemsize = jnp.dtype(x2d.dtype).itemsize

    # Double-buffered explicit tiles must stay well under v7x's 64 MiB VMEM
    # (32 MiB default scoped).  Budget ~16 MiB for (in + out) * 2 buffers.
    budget = 16 << 20
    per_row = 2 * (l + seq_len) * itemsize
    tr_max = max(1, budget // per_row)

    if tr_max >= total_rows:
        tr = total_rows                      # full rows dim -> (8,128) rule satisfied
    else:
        tr = (tr_max // 8) * 8               # multiple of 8 sublanes
        if tr < 8:
            return None                      # can't tile legally; caller falls back

    num_tiles = pl.cdiv(total_rows, tr)
    kernel = functools.partial(
        _cut_sequence_vmem_kernel, offset=offset, seq_len=seq_len)

    return pl.pallas_call(
        kernel,
        out_shape=jax.ShapeDtypeStruct((total_rows, seq_len), x2d.dtype),
        grid=(num_tiles,),
        in_specs=[pl.BlockSpec((tr, l), lambda i: (i, 0))],
        out_specs=pl.BlockSpec((tr, seq_len), lambda i: (i, 0)),
        compiler_params=pltpu.CompilerParams(
            dimension_semantics=("parallel",),   # v7x: TCs split row tiles
            vmem_limit_bytes=32 << 20,           # explicit; safe on v5e/v6e/v7x
        ),
    )(x2d)


# --------------------------------------------------------------------------
# Public wrapper.
# --------------------------------------------------------------------------
def cut_sequence(x: jax.Array, seq_len: int, *, offset: int = 1) -> jax.Array:
    """Pallas equivalent of CutSequence(offset)(x, seq_len).

    x: (N, C, L) array (default row-major layout assumed); returns a fresh
    contiguous (N, C, seq_len) array.
    """
    n, c, l = x.shape
    seq_len = int(seq_len)
    if seq_len <= 0:
        raise ValueError(f"seq_len must be positive, got {seq_len}")
    if offset < 0 or offset + seq_len > l:
        raise ValueError(
            f"offset ({offset}) + seq_len ({seq_len}) exceeds sequence length ({l})")

    total_rows = n * c
    itemsize = jnp.dtype(x.dtype).itemsize
    row_bytes = seq_len * itemsize

    # Metadata-only for the default row-major layout (documented assumption;
    # a non-default layout would make XLA materialize this reshape).
    x2d = x.reshape(total_rows, l)

    out2d = None
    if row_bytes < 512:
        # Strided HBM reads this narrow waste most of each HBM burst; stage
        # full contiguous rows through VMEM instead.
        out2d = _cut_sequence_vmem(x2d, seq_len, offset)
    if out2d is None:
        out2d = _cut_sequence_dma(x2d, seq_len, offset)

    return out2d.reshape(n, c, seq_len)


class CutSequence:
    """Thin wrapper mirroring the PyTorch module's interface."""

    def __init__(self, offset: int = 1):
        self.offset = offset
        self.takes_extra_args = True

    def __call__(self, x, seq_len):
        return cut_sequence(x, int(seq_len), offset=self.offset)


if __name__ == "__main__":
    key = jax.random.PRNGKey(0)
    k1, k2 = jax.random.split(key)
    mod = CutSequence(offset=1)

    # Small shape (batch=2, channels=4, L=16, seq_len=8): 32 B rows ->
    # exercises the VMEM-staged small-seq_len path.
    x_small = jax.random.normal(k1, (2, 4, 16), dtype=jnp.float32)
    out_small = jax.block_until_ready(mod(x_small, 8))
    ref_small = x_small[:, :, 1:1 + 8]
    assert out_small.shape == (2, 4, 8), out_small.shape
    assert out_small.dtype == x_small.dtype
    assert jnp.array_equal(out_small, ref_small), "VMEM path mismatch vs reference"

    # Wider shape (batch=2, channels=4, L=512, seq_len=256): 1 KiB rows ->
    # exercises the direct HBM->HBM DMA path (single step, concurrent DMAs).
    x_wide = jax.random.normal(k2, (2, 4, 512), dtype=jnp.float32)
    out_wide = jax.block_until_ready(mod(x_wide, 256))
    ref_wide = x_wide[:, :, 1:1 + 256]
    assert out_wide.shape == (2, 4, 256), out_wide.shape
    assert out_wide.dtype == x_wide.dtype
    assert jnp.array_equal(out_wide, ref_wide), "DMA path mismatch vs reference"

    print("KERNEL_OK")
</pallas_src>

<mosaic_0001>
module attributes {stable_mosaic.version = 11 : i64} {
  func.func @_cut_sequence_vmem_kernel(%arg0: i32, %arg1: memref<8x16xf32, #tpu.memory_space<vmem>>, %arg2: memref<8x8xf32, #tpu.memory_space<vmem>>) attributes {dimension_semantics = [#tpu.dimension_semantics<parallel>], iteration_bounds = array<i64: 1>, scalar_prefetch = 0 : i64, scratch_operands = 0 : i64, tpu.core_type = #tpu.core_type<tc>, window_params = [{transform_indices = @transform_0, window_bounds = array<i64: 8, 16>}, {transform_indices = @transform_1, window_bounds = array<i64: 8, 8>}]} {
    %c0 = arith.constant 0 : index
    %c1 = arith.constant 1 : index
    %0 = vector.load %arg1[%c0, %c1] : memref<8x16xf32, #tpu.memory_space<vmem>>, vector<8x8xf32>
    %c0_0 = arith.constant 0 : index
    %c0_1 = arith.constant 0 : index
    %1 = vector.load %arg2[%c0_0, %c0_1] : memref<8x8xf32, #tpu.memory_space<vmem>>, vector<8x8xf32>
    tpu.vector_store %arg2[%c0_0, %c0_1], %0 {strides = array<i32>} : memref<8x8xf32, #tpu.memory_space<vmem>>, vector<8x8xf32>,
    return
  }
  func.func @transform_0(%arg0: i32) -> (i32, i32) {
    %c0_i32 = arith.constant 0 : i32
    %c0_i32_0 = arith.constant 0 : i32
    return %arg0, %c0_i32 : i32, i32
  }
  func.func @transform_1(%arg0: i32) -> (i32, i32) {
    %c0_i32 = arith.constant 0 : i32
    %c0_i32_0 = arith.constant 0 : i32
    return %arg0, %c0_i32 : i32, i32
  }
}

</mosaic_0001>

<bundles_post_ra>
// kernel: tpu_custom_call.1
= control target key start
LH: loop header
LB: loop body
LE: loop exit
PB: predicated region body
PF: predicated region fallthrough
CT: control target
= control target key end

     0   :  { %6 = vsyncpa [#allocation3], 0  ;;  %s109_s0 = inlined_call_operand.hbm [shape: f32[8,16], index: 0, kind: input, shape index: {}]   ;;  %s110_s1 = inlined_call_operand.hbm [shape: f32[8,8], index: 1, kind: output, shape index: {}]  }
   0x1   :  { %7 = vsyncpa [#allocation4], 0  ;;  %s90_s6 = smov [#allocation2]  }
   0x2   :  { %s14_s7 = sshll.u32 %s90_s6, 4  ;;  %s15_s7 = int_to_ptr.vmem [resolvable:$true] %s14_s7 }
   0x3   :  { %s54_s8 = scalar_lea.vmem %s15_s7, 128  ;;  %p59_p1 = scmp.lt.s32.totalorder %s15_s7, %s15_s7 }
   0x4   :  { %p55_p0 = scmp.ne.s32.totalorder %s15_s7, %s54_s8  ;;  %p60_p2 = scmp.lt.s32.totalorder %s54_s8, %s54_s8 }
   0x6   :  { %p61_p3 = por %p60_p2, %p59_p1 }
   0x8   :  { %p62_p4 = pnand %p61_p3, %p55_p0 }
   0xa   :  { %65 = shalt.err (!%p62_p4)
}
   0xb   :  { %17 = dma.hbm_to_vmem [thread:$0]  %s109_s0, 128, %s15_s7, [#allocation3]  }
   0xc   :  { %86 = dma.done.wait [#allocation3], 128  }
   0xd   :  { %87 = vsyncadd [#allocation3], 4294967168  ;;  %v21_v0 = vld [vmem:[#allocation2] sm:$0xff]  ;;  %s91_s11 = smov 127   ;;  %s92_s12 = smov [#allocation5]   ;;  %vm26_vm0 = vcmask 64512  }
   0xe   :  { %23 = vrot.lane.b32.xlu0 %v21_v0, %s91_s11  ;;  %s34_s13 = sshll.u32 %s92_s12, 4  ;;  %s35_s13 = int_to_ptr.vmem [resolvable:$true] %s34_s13 }
   0xf   :  { %s66_s14 = scalar_lea.vmem %s35_s13, 128  ;;  %p71_p6 = scmp.lt.s32.totalorder %s35_s13, %s35_s13 }
  0x10   :  { %p67_p5 = scmp.ne.s32.totalorder %s35_s13, %s66_s14  ;;  %p72_p7 = scmp.lt.s32.totalorder %s66_s14, %s66_s14 }
  0x12   :  { %p73_p8 = por %p72_p7, %p71_p6 }
  0x14   :  { %p74_p9 = pnand %p73_p8, %p67_p5 }
  0x80   :  { %v24_v1 = vpop.permute.xlu0 %23 }
  0x81   :  { %27 = vst.msk [vmem:[#allocation5] sm:$0xff] %vm26_vm0, %v24_v1 }
  0x82   :  { %77 = shalt.err (!%p74_p9)
}
  0x83   :  { %37 = dma.vmem_to_hbm [thread:$0]  %s35_s13, 128, %s110_s1, [#allocation4]  }
  0x84   :  { %88 = dma.done.wait [#allocation4], 128  }
  0x85   :  { %89 = vsyncadd [#allocation4], 4294967168 }
  0x86   :  { %41 = vsyncpa [#allocation3], 1 }
  0x87   :  { %42 = vsyncpa [#allocation4], 1 }

</bundles_post_ra>
